<compile_context>
chip_gen: v7x
topology: tpu7x:2x2x1
jax: 0.10.0
libtpu: 0.0.40
codegen_flags: <defaults>
</compile_context>

<pallas_src>
import functools

import jax
import jax.numpy as jnp
from jax import lax
from jax.experimental import pallas as pl
from jax.experimental.pallas import tpu as pltpu

S = 10                       # fixed by the module (reshape(-1, 10), labels 0..9)
SMOOTHING = 0.1
CONFIDENCE = 1.0 - SMOOTHING
TEMP = 0.07
_NEG = -1e30                 # finite "-inf" for masked (cross-batch) logits


def _l2_normalize(x):
    # matches F.normalize(p=2, dim=-1, eps=1e-12): x / max(||x||, eps)
    n = jnp.sqrt(jnp.sum(x * x, axis=-1, keepdims=True))
    return x / jnp.maximum(n, 1e-12)


def contrastive_kernel(a_ref, v_ref, z_ref, wa_ref, ba_ref, wv_ref, bv_ref,
                       td_ref, nb_ref, bid_ref,
                       zfa_ref, zfv_ref, af_ref, vf_ref, loss_ref,
                       *, tb, b_actual, denom):
    t = pl.program_id(0)

    a = a_ref[...].astype(jnp.float32)          # (N, H), N = TB*S
    v = v_ref[...].astype(jnp.float32)
    z = z_ref[...].astype(jnp.float32)

    a_feat = _l2_normalize(a)
    v_feat = _l2_normalize(v)

    za = jnp.dot(z, wa_ref[...], preferred_element_type=jnp.float32) + ba_ref[...]
    zv = jnp.dot(z, wv_ref[...], preferred_element_type=jnp.float32) + bv_ref[...]
    z_feat_a = _l2_normalize(za)
    z_feat_v = _l2_normalize(zv)

    # feature writebacks (storage dtype == input dtype)
    zfa_ref[...] = z_feat_a.astype(zfa_ref.dtype)
    zfv_ref[...] = z_feat_v.astype(zfv_ref.dtype)
    af_ref[...] = a_feat.astype(af_ref.dtype)
    vf_ref[...] = v_feat.astype(vf_ref.dtype)

    neg_bias = nb_ref[...]                       # (N, N): 0 same-batch, -1e30 cross
    true_dist = td_ref[...]                      # (N, N): 0.9 diag / 0.1/9 block / 0
    # mask out padded batch rows of the tail tile
    valid = ((t * tb + bid_ref[...]) < b_actual).astype(jnp.float32)   # (N, 1)

    def stream_loss(zf, feat):
        # zf @ feat.T via dot_general contracting last dims (no explicit transpose)
        lg = lax.dot_general(zf, feat, (((1,), (1,)), ((), ())),
                             preferred_element_type=jnp.float32)
        lg = lg * (1.0 / TEMP) + neg_bias        # restrict softmax to same batch elem
        m = jnp.max(lg, axis=-1, keepdims=True)
        lse = jnp.log(jnp.sum(jnp.exp(lg - m), axis=-1, keepdims=True)) + m
        logp = lg - lse
        # true_dist is 0 at masked positions, so the -1e30 logp there contributes 0
        return jnp.sum(valid * (true_dist * logp))

    loss_val = -(stream_loss(z_feat_a, a_feat)
                 + stream_loss(z_feat_v, v_feat)) * (1.0 / denom)
    loss_ref[...] = jnp.broadcast_to(loss_val, (1, 1, 1))


def _step_vmem_bytes(tb, H, itemsize):
    n = tb * S
    io = 7 * n * H * itemsize * 2              # 3 inputs + 4 outputs, double-buffered
    wts = 2 * (2 * H * H * 4 + 2 * H * 4)      # two (H,H) weights + biases
    masks = 2 * (2 * n * n * 4 + n * 4)        # true_dist, neg_bias, block ids
    tmps = 8 * n * H * 4 + 4 * n * n * 4       # rough in-kernel f32 temporaries
    return io + wts + masks + tmps


def contrastive_criterion(a_out, v_out, z_out, w_a, b_a, w_v, b_v, *, tb=None):
    B, S_, H = a_out.shape
    assert S_ == S, "module semantics require seq/class dim == 10"
    dtype = a_out.dtype
    itemsize = jnp.dtype(dtype).itemsize

    # --- choose batch tile TB (rows per step = TB*S) -------------------------
    if tb is None:
        if B <= 16:
            tb = B                                   # single tile, block == full array
        else:
            tb = 16                                  # 160 matmul rows per step
            while tb > 4 and _step_vmem_bytes(tb, H, itemsize) > 20 * 1024 * 1024:
                tb -= 4                              # keep TB*S a multiple of 8
    num_tiles = pl.cdiv(B, tb)
    B_pad = num_tiles * tb
    N = tb * S

    # --- prepare inputs (2-D lane/sublane-dense layout, padded batch) --------
    a2 = jnp.asarray(a_out).reshape(B * S, H)
    v2 = jnp.asarray(v_out).reshape(B * S, H)
    z2 = jnp.asarray(z_out).reshape(B * S, H)
    if B_pad != B:
        pad = ((0, (B_pad - B) * S), (0, 0))
        a2 = jnp.pad(a2, pad)
        v2 = jnp.pad(v2, pad)
        z2 = jnp.pad(z2, pad)

    # torch Linear: y = x @ W.T + b  (W stored (out,in)) -> pass W.T
    wa_t = jnp.asarray(w_a, jnp.float32).T
    wv_t = jnp.asarray(w_v, jnp.float32).T
    ba2 = jnp.asarray(b_a, jnp.float32).reshape(1, H)
    bv2 = jnp.asarray(b_v, jnp.float32).reshape(1, H)

    # precomputed tile-invariant masks (avoid per-step iota / integer division)
    blk = (jnp.arange(N, dtype=jnp.int32) // S)
    same = blk[:, None] == blk[None, :]
    eye = jnp.arange(N)[:, None] == jnp.arange(N)[None, :]
    true_dist = jnp.where(eye, CONFIDENCE,
                          jnp.where(same, SMOOTHING / (S - 1), 0.0)).astype(jnp.float32)
    neg_bias = jnp.where(same, 0.0, _NEG).astype(jnp.float32)
    row_bid = blk.reshape(N, 1).astype(jnp.int32)

    # --- block specs ----------------------------------------------------------
    feat_spec = pl.BlockSpec((N, H), lambda t: (t, 0))
    w_spec = pl.BlockSpec((H, H), lambda t: (0, 0))
    b_spec = pl.BlockSpec((1, H), lambda t: (0, 0))
    mask_spec = pl.BlockSpec((N, N), lambda t: (0, 0))
    bid_spec = pl.BlockSpec((N, 1), lambda t: (0, 0))
    loss_spec = pl.BlockSpec((1, 1, 1), lambda t: (t, 0, 0))

    out_shapes = tuple(jax.ShapeDtypeStruct((B_pad * S, H), dtype) for _ in range(4)) \
        + (jax.ShapeDtypeStruct((num_tiles, 1, 1), jnp.float32),)
    out_specs = (feat_spec,) * 4 + (loss_spec,)

    kernel = functools.partial(contrastive_kernel, tb=tb, b_actual=B,
                               denom=float(B * S))

    outs = pl.pallas_call(
        kernel,
        out_shape=out_shapes,
        grid_spec=pltpu.PrefetchScalarGridSpec(
            num_scalar_prefetch=0,
            grid=(num_tiles,),
            in_specs=[feat_spec, feat_spec, feat_spec,
                      w_spec, b_spec, w_spec, b_spec,
                      mask_spec, mask_spec, bid_spec],
            out_specs=out_specs,
        ),
        compiler_params=pltpu.CompilerParams(
            dimension_semantics=("parallel",),       # per-tile loss partials -> no race
            vmem_limit_bytes=48 * 1024 * 1024,
        ),
    )(a2, v2, z2, wa_t, ba2, wv_t, bv2, true_dist, neg_bias, row_bid)

    zfa2, zfv2, af2, vf2, loss_partials = outs
    zfa = zfa2.reshape(B_pad, S, H)[:B]
    zfv = zfv2.reshape(B_pad, S, H)[:B]
    af = af2.reshape(B_pad, S, H)[:B]
    vf = vf2.reshape(B_pad, S, H)[:B]
    loss = jnp.sum(loss_partials)

    outputs = {'z_feat_a': zfa, 'z_feat_v': zfv, 'a_feat': af, 'v_feat': vf,
               'a_out': af + zfa, 'v_out': vf + zfv}   # derived outside (bandwidth)
    return loss, outputs


def _reference(a_out, v_out, z_out, w_a, b_a, w_v, b_v):
    def norm(x):
        return x / jnp.maximum(jnp.linalg.norm(x, axis=-1, keepdims=True), 1e-12)
    a_feat = norm(a_out)
    v_feat = norm(v_out)
    z_feat_a = norm(z_out @ w_a.T + b_a)
    z_feat_v = norm(z_out @ w_v.T + b_v)
    logits1 = (jnp.einsum('bij,bkj->bik', z_feat_a, a_feat) / TEMP).reshape(-1, S)
    logits2 = (jnp.einsum('bij,bkj->bik', z_feat_v, v_feat) / TEMP).reshape(-1, S)
    labels = jnp.tile(jnp.arange(S), a_out.shape[0])

    def ls(pred, target):
        logp = jax.nn.log_softmax(pred, axis=-1)
        true_dist = jnp.full_like(logp, SMOOTHING / (S - 1))
        true_dist = true_dist.at[jnp.arange(pred.shape[0]), target].set(CONFIDENCE)
        return jnp.mean(jnp.sum(-true_dist * logp, axis=-1))

    loss = ls(logits1, labels) + ls(logits2, labels)
    outputs = {'z_feat_a': z_feat_a, 'z_feat_v': z_feat_v, 'a_feat': a_feat,
               'v_feat': v_feat, 'a_out': a_feat + z_feat_a, 'v_out': v_feat + z_feat_v}
    return loss, outputs


if __name__ == "__main__":
    B, H = 2, 32     # batch=2, hid_dim=32; S is fixed at 10 by the module
    key = jax.random.PRNGKey(0)
    k1, k2, k3, k4, k5, k6, k7 = jax.random.split(key, 7)

    a_out = jax.random.normal(k1, (B, S, H), jnp.float32)
    v_out = jax.random.normal(k2, (B, S, H), jnp.float32)
    z_out = jax.random.normal(k3, (B, S, H), jnp.float32)

    # nn.Linear(hid_dim, hid_dim) parameter shapes: W (H,H), b (H,)
    bound = 1.0 / (H ** 0.5)
    w_a = jax.random.uniform(k4, (H, H), jnp.float32, -bound, bound)
    b_a = jax.random.uniform(k5, (H,), jnp.float32, -bound, bound)
    w_v = jax.random.uniform(k6, (H, H), jnp.float32, -bound, bound)
    b_v = jax.random.uniform(k7, (H,), jnp.float32, -bound, bound)

    loss, outputs = contrastive_criterion(a_out, v_out, z_out, w_a, b_a, w_v, b_v)
    loss = jax.block_until_ready(loss)
    for val in outputs.values():
        jax.block_until_ready(val)

    ref_loss, ref_outputs = _reference(a_out, v_out, z_out, w_a, b_a, w_v, b_v)
    assert jnp.allclose(loss, ref_loss, atol=1e-3, rtol=1e-3), (loss, ref_loss)
    for name in ('z_feat_a', 'z_feat_v', 'a_feat', 'v_feat', 'a_out', 'v_out'):
        assert jnp.allclose(outputs[name], ref_outputs[name], atol=1e-3, rtol=1e-3), name

    print("KERNEL_OK")
</pallas_src>

<mosaic_0001>
module attributes {stable_mosaic.version = 11 : i64} {
  func.func @contrastive_kernel(%arg0: i32, %arg1: memref<20x32xf32, #tpu.memory_space<vmem>>, %arg2: memref<20x32xf32, #tpu.memory_space<vmem>>, %arg3: memref<20x32xf32, #tpu.memory_space<vmem>>, %arg4: memref<32x32xf32, #tpu.memory_space<vmem>>, %arg5: memref<1x32xf32, #tpu.memory_space<vmem>>, %arg6: memref<32x32xf32, #tpu.memory_space<vmem>>, %arg7: memref<1x32xf32, #tpu.memory_space<vmem>>, %arg8: memref<20x20xf32, #tpu.memory_space<vmem>>, %arg9: memref<20x20xf32, #tpu.memory_space<vmem>>, %arg10: memref<20x1xi32, #tpu.memory_space<vmem>>, %arg11: memref<20x32xf32, #tpu.memory_space<vmem>>, %arg12: memref<20x32xf32, #tpu.memory_space<vmem>>, %arg13: memref<20x32xf32, #tpu.memory_space<vmem>>, %arg14: memref<20x32xf32, #tpu.memory_space<vmem>>, %arg15: memref<1x1x1xf32, #tpu.memory_space<vmem>>) attributes {dimension_semantics = [#tpu.dimension_semantics<parallel>], iteration_bounds = array<i64: 1>, scalar_prefetch = 0 : i64, scratch_operands = 0 : i64, tpu.core_type = #tpu.core_type<tc>, window_params = [{transform_indices = @transform_0, window_bounds = array<i64: 20, 32>}, {transform_indices = @transform_1, window_bounds = array<i64: 20, 32>}, {transform_indices = @transform_2, window_bounds = array<i64: 20, 32>}, {pipeline_mode = #tpu.pipeline_mode<synchronous>, transform_indices = @transform_3, window_bounds = array<i64: 32, 32>}, {pipeline_mode = #tpu.pipeline_mode<synchronous>, transform_indices = @transform_4, window_bounds = array<i64: 1, 32>}, {pipeline_mode = #tpu.pipeline_mode<synchronous>, transform_indices = @transform_5, window_bounds = array<i64: 32, 32>}, {pipeline_mode = #tpu.pipeline_mode<synchronous>, transform_indices = @transform_6, window_bounds = array<i64: 1, 32>}, {pipeline_mode = #tpu.pipeline_mode<synchronous>, transform_indices = @transform_7, window_bounds = array<i64: 20, 20>}, {pipeline_mode = #tpu.pipeline_mode<synchronous>, transform_indices = @transform_8, window_bounds = array<i64: 20, 20>}, {pipeline_mode = #tpu.pipeline_mode<synchronous>, transform_indices = @transform_9, window_bounds = array<i64: 20, 1>}, {transform_indices = @transform_10, window_bounds = array<i64: 20, 32>}, {transform_indices = @transform_11, window_bounds = array<i64: 20, 32>}, {transform_indices = @transform_12, window_bounds = array<i64: 20, 32>}, {transform_indices = @transform_13, window_bounds = array<i64: 20, 32>}, {transform_indices = @transform_14, window_bounds = array<i64: 1, 1, 1>}]} {
    %c0 = arith.constant 0 : index
    %c0_0 = arith.constant 0 : index
    %0 = vector.load %arg1[%c0, %c0_0] : memref<20x32xf32, #tpu.memory_space<vmem>>, vector<20x32xf32>
    %c0_1 = arith.constant 0 : index
    %c0_2 = arith.constant 0 : index
    %1 = vector.load %arg2[%c0_1, %c0_2] : memref<20x32xf32, #tpu.memory_space<vmem>>, vector<20x32xf32>
    %c0_3 = arith.constant 0 : index
    %c0_4 = arith.constant 0 : index
    %2 = vector.load %arg3[%c0_3, %c0_4] : memref<20x32xf32, #tpu.memory_space<vmem>>, vector<20x32xf32>
    %3 = arith.mulf %0, %0 : vector<20x32xf32>
    %cst = arith.constant dense<0.000000e+00> : vector<20xf32>
    %4 = vector.multi_reduction <add>, %3, %cst [1] : vector<20x32xf32> to vector<20xf32>
    %5 = vector.shape_cast %4 : vector<20xf32> to vector<20x1xf32>
    %6 = math.sqrt %5 : vector<20x1xf32>
    %cst_5 = arith.constant 9.99999996E-13 : f32
    %7 = vector.broadcast %cst_5 : f32 to vector<20x1xf32>
    %8 = arith.maximumf %6, %7 : vector<20x1xf32>
    %9 = vector.broadcast %8 : vector<20x1xf32> to vector<20x32xf32>
    %10 = arith.divf %0, %9 : vector<20x32xf32>
    %11 = arith.mulf %1, %1 : vector<20x32xf32>
    %cst_6 = arith.constant dense<0.000000e+00> : vector<20xf32>
    %12 = vector.multi_reduction <add>, %11, %cst_6 [1] : vector<20x32xf32> to vector<20xf32>
    %13 = vector.shape_cast %12 : vector<20xf32> to vector<20x1xf32>
    %14 = math.sqrt %13 : vector<20x1xf32>
    %cst_7 = arith.constant 9.99999996E-13 : f32
    %15 = vector.broadcast %cst_7 : f32 to vector<20x1xf32>
    %16 = arith.maximumf %14, %15 : vector<20x1xf32>
    %17 = vector.broadcast %16 : vector<20x1xf32> to vector<20x32xf32>
    %18 = arith.divf %1, %17 : vector<20x32xf32>
    %c0_8 = arith.constant 0 : index
    %c0_9 = arith.constant 0 : index
    %19 = vector.load %arg4[%c0_8, %c0_9] : memref<32x32xf32, #tpu.memory_space<vmem>>, vector<32x32xf32>
    %cst_10 = arith.constant dense<0.000000e+00> : vector<20x32xf32>
    %20 = tpu.matmul %2, %19, %cst_10 {dimension_numbers = #tpu.dot_dimension_numbers<[1], [0], [0], [1], [0, 0, 1, 1], [], []>} : vector<20x32xf32>, vector<32x32xf32>, vector<20x32xf32> -> vector<20x32xf32>
    %c0_11 = arith.constant 0 : index
    %c0_12 = arith.constant 0 : index
    %21 = vector.load %arg5[%c0_11, %c0_12] : memref<1x32xf32, #tpu.memory_space<vmem>>, vector<1x32xf32>
    %22 = vector.broadcast %21 : vector<1x32xf32> to vector<20x32xf32>
    %23 = arith.addf %20, %22 : vector<20x32xf32>
    %c0_13 = arith.constant 0 : index
    %c0_14 = arith.constant 0 : index
    %24 = vector.load %arg6[%c0_13, %c0_14] : memref<32x32xf32, #tpu.memory_space<vmem>>, vector<32x32xf32>
    %cst_15 = arith.constant dense<0.000000e+00> : vector<20x32xf32>
    %25 = tpu.matmul %2, %24, %cst_15 {dimension_numbers = #tpu.dot_dimension_numbers<[1], [0], [0], [1], [0, 0, 1, 1], [], []>} : vector<20x32xf32>, vector<32x32xf32>, vector<20x32xf32> -> vector<20x32xf32>
    %c0_16 = arith.constant 0 : index
    %c0_17 = arith.constant 0 : index
    %26 = vector.load %arg7[%c0_16, %c0_17] : memref<1x32xf32, #tpu.memory_space<vmem>>, vector<1x32xf32>
    %27 = vector.broadcast %26 : vector<1x32xf32> to vector<20x32xf32>
    %28 = arith.addf %25, %27 : vector<20x32xf32>
    %29 = arith.mulf %23, %23 : vector<20x32xf32>
    %cst_18 = arith.constant dense<0.000000e+00> : vector<20xf32>
    %30 = vector.multi_reduction <add>, %29, %cst_18 [1] : vector<20x32xf32> to vector<20xf32>
    %31 = vector.shape_cast %30 : vector<20xf32> to vector<20x1xf32>
    %32 = math.sqrt %31 : vector<20x1xf32>
    %cst_19 = arith.constant 9.99999996E-13 : f32
    %33 = vector.broadcast %cst_19 : f32 to vector<20x1xf32>
    %34 = arith.maximumf %32, %33 : vector<20x1xf32>
    %35 = vector.broadcast %34 : vector<20x1xf32> to vector<20x32xf32>
    %36 = arith.divf %23, %35 : vector<20x32xf32>
    %37 = arith.mulf %28, %28 : vector<20x32xf32>
    %cst_20 = arith.constant dense<0.000000e+00> : vector<20xf32>
    %38 = vector.multi_reduction <add>, %37, %cst_20 [1] : vector<20x32xf32> to vector<20xf32>
    %39 = vector.shape_cast %38 : vector<20xf32> to vector<20x1xf32>
    %40 = math.sqrt %39 : vector<20x1xf32>
    %cst_21 = arith.constant 9.99999996E-13 : f32
    %41 = vector.broadcast %cst_21 : f32 to vector<20x1xf32>
    %42 = arith.maximumf %40, %41 : vector<20x1xf32>
    %43 = vector.broadcast %42 : vector<20x1xf32> to vector<20x32xf32>
    %44 = arith.divf %28, %43 : vector<20x32xf32>
    %c0_22 = arith.constant 0 : index
    %c0_23 = arith.constant 0 : index
    %45 = vector.load %arg11[%c0_22, %c0_23] : memref<20x32xf32, #tpu.memory_space<vmem>>, vector<20x32xf32>
    tpu.vector_store %arg11[%c0_22, %c0_23], %36 {strides = array<i32>} : memref<20x32xf32, #tpu.memory_space<vmem>>, vector<20x32xf32>,
    %c0_24 = arith.constant 0 : index
    %c0_25 = arith.constant 0 : index
    %46 = vector.load %arg12[%c0_24, %c0_25] : memref<20x32xf32, #tpu.memory_space<vmem>>, vector<20x32xf32>
    tpu.vector_store %arg12[%c0_24, %c0_25], %44 {strides = array<i32>} : memref<20x32xf32, #tpu.memory_space<vmem>>, vector<20x32xf32>,
    %c0_26 = arith.constant 0 : index
    %c0_27 = arith.constant 0 : index
    %47 = vector.load %arg13[%c0_26, %c0_27] : memref<20x32xf32, #tpu.memory_space<vmem>>, vector<20x32xf32>
    tpu.vector_store %arg13[%c0_26, %c0_27], %10 {strides = array<i32>} : memref<20x32xf32, #tpu.memory_space<vmem>>, vector<20x32xf32>,
    %c0_28 = arith.constant 0 : index
    %c0_29 = arith.constant 0 : index
    %48 = vector.load %arg14[%c0_28, %c0_29] : memref<20x32xf32, #tpu.memory_space<vmem>>, vector<20x32xf32>
    tpu.vector_store %arg14[%c0_28, %c0_29], %18 {strides = array<i32>} : memref<20x32xf32, #tpu.memory_space<vmem>>, vector<20x32xf32>,
    %c0_30 = arith.constant 0 : index
    %c0_31 = arith.constant 0 : index
    %49 = vector.load %arg9[%c0_30, %c0_31] : memref<20x20xf32, #tpu.memory_space<vmem>>, vector<20x20xf32>
    %c0_32 = arith.constant 0 : index
    %c0_33 = arith.constant 0 : index
    %50 = vector.load %arg8[%c0_32, %c0_33] : memref<20x20xf32, #tpu.memory_space<vmem>>, vector<20x20xf32>
    %c2_i32 = arith.constant 2 : i32
    %51 = arith.muli %arg0, %c2_i32 : i32
    %c0_34 = arith.constant 0 : index
    %c0_35 = arith.constant 0 : index
    %52 = vector.load %arg10[%c0_34, %c0_35] : memref<20x1xi32, #tpu.memory_space<vmem>>, vector<20x1xi32>
    %53 = vector.broadcast %51 : i32 to vector<20x1xi32>
    %54 = arith.addi %53, %52 : vector<20x1xi32>
    %c2_i32_36 = arith.constant 2 : i32
    %55 = vector.broadcast %c2_i32_36 : i32 to vector<20x1xi32>
    %56 = arith.cmpi slt, %54, %55 : vector<20x1xi32>
    %57 = arith.extui %56 : vector<20x1xi1> to vector<20x1xi32>
    %58 = arith.sitofp %57 : vector<20x1xi32> to vector<20x1xf32>
    %cst_37 = arith.constant dense<0.000000e+00> : vector<20x20xf32>
    %59 = tpu.matmul %36, %10, %cst_37 {dimension_numbers = #tpu.dot_dimension_numbers<[1], [1], [0], [0], [0, 0, 1, 0], [], []>} : vector<20x32xf32>, vector<20x32xf32>, vector<20x20xf32> -> vector<20x20xf32>
    %cst_38 = arith.constant 14.2857141 : f32
    %60 = vector.broadcast %cst_38 : f32 to vector<20x20xf32>
    %61 = arith.mulf %59, %60 : vector<20x20xf32>
    %62 = arith.addf %61, %49 : vector<20x20xf32>
    %cst_39 = arith.constant dense<0xFF800000> : vector<20xf32>
    %63 = vector.multi_reduction <maximumf>, %62, %cst_39 [1] : vector<20x20xf32> to vector<20xf32>
    %64 = vector.shape_cast %63 : vector<20xf32> to vector<20x1xf32>
    %65 = vector.broadcast %64 : vector<20x1xf32> to vector<20x20xf32>
    %66 = arith.subf %62, %65 : vector<20x20xf32>
    %67 = math.exp %66 : vector<20x20xf32>
    %cst_40 = arith.constant dense<0.000000e+00> : vector<20xf32>
    %68 = vector.multi_reduction <add>, %67, %cst_40 [1] : vector<20x20xf32> to vector<20xf32>
    %69 = vector.shape_cast %68 : vector<20xf32> to vector<20x1xf32>
    %70 = math.log %69 : vector<20x1xf32>
    %71 = arith.addf %70, %64 : vector<20x1xf32>
    %72 = vector.broadcast %71 : vector<20x1xf32> to vector<20x20xf32>
    %73 = arith.subf %62, %72 : vector<20x20xf32>
    %74 = arith.mulf %50, %73 : vector<20x20xf32>
    %75 = vector.broadcast %58 : vector<20x1xf32> to vector<20x20xf32>
    %76 = arith.mulf %75, %74 : vector<20x20xf32>
    %77 = vector.shape_cast %76 : vector<20x20xf32> to vector<1x20x20xf32>
    %cst_41 = arith.constant dense<0.000000e+00> : vector<1xf32>
    %78 = vector.multi_reduction <add>, %77, %cst_41 [1, 2] : vector<1x20x20xf32> to vector<1xf32>
    %79 = vector.shape_cast %78 : vector<1xf32> to vector<1x1x1xf32>
    %80 = vector.extract %79[0, 0, 0] : f32 from vector<1x1x1xf32>
    %cst_42 = arith.constant dense<0.000000e+00> : vector<20x20xf32>
    %81 = tpu.matmul %44, %18, %cst_42 {dimension_numbers = #tpu.dot_dimension_numbers<[1], [1], [0], [0], [0, 0, 1, 0], [], []>} : vector<20x32xf32>, vector<20x32xf32>, vector<20x20xf32> -> vector<20x20xf32>
    %cst_43 = arith.constant 14.2857141 : f32
    %82 = vector.broadcast %cst_43 : f32 to vector<20x20xf32>
    %83 = arith.mulf %81, %82 : vector<20x20xf32>
    %84 = arith.addf %83, %49 : vector<20x20xf32>
    %cst_44 = arith.constant dense<0xFF800000> : vector<20xf32>
    %85 = vector.multi_reduction <maximumf>, %84, %cst_44 [1] : vector<20x20xf32> to vector<20xf32>
    %86 = vector.shape_cast %85 : vector<20xf32> to vector<20x1xf32>
    %87 = vector.broadcast %86 : vector<20x1xf32> to vector<20x20xf32>
    %88 = arith.subf %84, %87 : vector<20x20xf32>
    %89 = math.exp %88 : vector<20x20xf32>
    %cst_45 = arith.constant dense<0.000000e+00> : vector<20xf32>
    %90 = vector.multi_reduction <add>, %89, %cst_45 [1] : vector<20x20xf32> to vector<20xf32>
    %91 = vector.shape_cast %90 : vector<20xf32> to vector<20x1xf32>
    %92 = math.log %91 : vector<20x1xf32>
    %93 = arith.addf %92, %86 : vector<20x1xf32>
    %94 = vector.broadcast %93 : vector<20x1xf32> to vector<20x20xf32>
    %95 = arith.subf %84, %94 : vector<20x20xf32>
    %96 = arith.mulf %50, %95 : vector<20x20xf32>
    %97 = vector.broadcast %58 : vector<20x1xf32> to vector<20x20xf32>
    %98 = arith.mulf %97, %96 : vector<20x20xf32>
    %99 = vector.shape_cast %98 : vector<20x20xf32> to vector<1x20x20xf32>
    %cst_46 = arith.constant dense<0.000000e+00> : vector<1xf32>
    %100 = vector.multi_reduction <add>, %99, %cst_46 [1, 2] : vector<1x20x20xf32> to vector<1xf32>
    %101 = vector.shape_cast %100 : vector<1xf32> to vector<1x1x1xf32>
    %102 = vector.extract %101[0, 0, 0] : f32 from vector<1x1x1xf32>
    %103 = arith.addf %80, %102 : f32
    %cst_47 = arith.constant 0.000000e+00 : f32
    %104 = arith.subf %cst_47, %103 : f32
    %cst_48 = arith.constant 5.000000e-02 : f32
    %105 = arith.mulf %104, %cst_48 : f32
    %106 = vector.broadcast %105 : f32 to vector<1x1x1xf32>
    %c0_49 = arith.constant 0 : index
    %c0_50 = arith.constant 0 : index
    %c0_51 = arith.constant 0 : index
    %107 = vector.load %arg15[%c0_49, %c0_50, %c0_51] : memref<1x1x1xf32, #tpu.memory_space<vmem>>, vector<1x1x1xf32>
    tpu.vector_store %arg15[%c0_49, %c0_50, %c0_51], %106 {strides = array<i32>} : memref<1x1x1xf32, #tpu.memory_space<vmem>>, vector<1x1x1xf32>,
    return
  }
  func.func @transform_0(%arg0: i32) -> (i32, i32) {
    %c0_i32 = arith.constant 0 : i32
    %c0_i32_0 = arith.constant 0 : i32
    return %arg0, %c0_i32 : i32, i32
  }
  func.func @transform_1(%arg0: i32) -> (i32, i32) {
    %c0_i32 = arith.constant 0 : i32
    %c0_i32_0 = arith.constant 0 : i32
    return %arg0, %c0_i32 : i32, i32
  }
  func.func @transform_2(%arg0: i32) -> (i32, i32) {
    %c0_i32 = arith.constant 0 : i32
    %c0_i32_0 = arith.constant 0 : i32
    return %arg0, %c0_i32 : i32, i32
  }
  func.func @transform_3(%arg0: i32) -> (i32, i32) {
    %c0_i32 = arith.constant 0 : i32
    %c0_i32_0 = arith.constant 0 : i32
    %c0_i32_1 = arith.constant 0 : i32
    return %c0_i32, %c0_i32_0 : i32, i32
  }
  func.func @transform_4(%arg0: i32) -> (i32, i32) {
    %c0_i32 = arith.constant 0 : i32
    %c0_i32_0 = arith.constant 0 : i32
    %c0_i32_1 = arith.constant 0 : i32
    return %c0_i32, %c0_i32_0 : i32, i32
  }
  func.func @transform_5(%arg0: i32) -> (i32, i32) {
    %c0_i32 = arith.constant 0 : i32
    %c0_i32_0 = arith.constant 0 : i32
    %c0_i32_1 = arith.constant 0 : i32
    return %c0_i32, %c0_i32_0 : i32, i32
  }
  func.func @transform_6(%arg0: i32) -> (i32, i32) {
    %c0_i32 = arith.constant 0 : i32
    %c0_i32_0 = arith.constant 0 : i32
    %c0_i32_1 = arith.constant 0 : i32
    return %c0_i32, %c0_i32_0 : i32, i32
  }
  func.func @transform_7(%arg0: i32) -> (i32, i32) {
    %c0_i32 = arith.constant 0 : i32
    %c0_i32_0 = arith.constant 0 : i32
    %c0_i32_1 = arith.constant 0 : i32
    return %c0_i32, %c0_i32_0 : i32, i32
  }
  func.func @transform_8(%arg0: i32) -> (i32, i32) {
    %c0_i32 = arith.constant 0 : i32
    %c0_i32_0 = arith.constant 0 : i32
    %c0_i32_1 = arith.constant 0 : i32
    return %c0_i32, %c0_i32_0 : i32, i32
  }
  func.func @transform_9(%arg0: i32) -> (i32, i32) {
    %c0_i32 = arith.constant 0 : i32
    %c0_i32_0 = arith.constant 0 : i32
    %c0_i32_1 = arith.constant 0 : i32
    return %c0_i32, %c0_i32_0 : i32, i32
  }
  func.func @transform_10(%arg0: i32) -> (i32, i32) {
    %c0_i32 = arith.constant 0 : i32
    %c0_i32_0 = arith.constant 0 : i32
    return %arg0, %c0_i32 : i32, i32
  }
  func.func @transform_11(%arg0: i32) -> (i32, i32) {
    %c0_i32 = arith.constant 0 : i32
    %c0_i32_0 = arith.constant 0 : i32
    return %arg0, %c0_i32 : i32, i32
  }
  func.func @transform_12(%arg0: i32) -> (i32, i32) {
    %c0_i32 = arith.constant 0 : i32
    %c0_i32_0 = arith.constant 0 : i32
    return %arg0, %c0_i32 : i32, i32
  }
  func.func @transform_13(%arg0: i32) -> (i32, i32) {
    %c0_i32 = arith.constant 0 : i32
    %c0_i32_0 = arith.constant 0 : i32
    return %arg0, %c0_i32 : i32, i32
  }
  func.func @transform_14(%arg0: i32) -> (i32, i32, i32) {
    %c0_i32 = arith.constant 0 : i32
    %c0_i32_0 = arith.constant 0 : i32
    %c0_i32_1 = arith.constant 0 : i32
    return %arg0, %c0_i32, %c0_i32_0 : i32, i32, i32
  }
}

</mosaic_0001>

<bundles_post_ra>
// kernel: tpu_custom_call.1
= control target key start
LH: loop header
LB: loop body
LE: loop exit
PB: predicated region body
PF: predicated region fallthrough
CT: control target
= control target key end

     0   :  { %20 = vsyncpa [#allocation3], 0  ;;  %s1985_s0 = inlined_call_operand.hbm [shape: f32[20,32], index: 0, kind: input, shape index: {}]   ;;  %s1986_s1 = inlined_call_operand.hbm [shape: f32[20,32], index: 1, kind: input, shape index: {}]   ;;  %s1987_s2 = inlined_call_operand.hbm [shape: f32[20,32], index: 2, kind: input, shape index: {}]   ;;  %s1988_s3 = inlined_call_operand.vmem [shape: f32[32,32], index: 3, kind: input, shape index: {}]   ;;  %s1989_s4 = inlined_call_operand.vmem [shape: f32[1,32], index: 4, kind: input, shape index: {}]   ;;  %s1990_s5 = inlined_call_operand.hbm [shape: f32[32,32], index: 5, kind: input, shape index: {}]   ;;  %s1991_s6 = inlined_call_operand.vmem [shape: f32[1,32], index: 6, kind: input, shape index: {}]   ;;  %s1992_s7 = inlined_call_operand.hbm [shape: f32[20,20], index: 7, kind: input, shape index: {}]   ;;  %s1993_s8 = inlined_call_operand.hbm [shape: f32[20,20], index: 8, kind: input, shape index: {}]   ;;  %s1994_s9 = inlined_call_operand.vmem [shape: s32[20,1], index: 9, kind: input, shape index: {}]   ;;  %s1995_s10 = inlined_call_operand.hbm [shape: f32[20,32], index: 10, kind: output, shape index: {0}]   ;;  %s1996_s11 = inlined_call_operand.hbm [shape: f32[20,32], index: 11, kind: output, shape index: {1}]   ;;  %s1997_s12 = inlined_call_operand.hbm [shape: f32[20,32], index: 12, kind: output, shape index: {2}]   ;;  %s1998_s13 = inlined_call_operand.hbm [shape: f32[20,32], index: 13, kind: output, shape index: {3}]   ;;  %s1999_s14 = inlined_call_operand.hbm [shape: f32[1,1,1], index: 14, kind: output, shape index: {4}]  }
   0x1   :  { %21 = vsyncpa [#allocation6], 0 }
   0x2   :  { %22 = vsyncpa [#allocation9], 0 }
   0x3   :  { %23 = vsyncpa [#allocation12], 0 }
   0x4   :  { %24 = vsyncpa [#allocation4], 0 }
   0x5   :  { %25 = vsyncpa [#allocation15], 0 }
   0x6   :  { %26 = vsyncpa [#allocation18], 0  ;;  %s1448_s29 = smov [#allocation5]   ;;  %s1449_s15 = smov [#allocation8]  }
   0x7   :  { %s44_s30 = sshll.u32 %s1448_s29, 4  ;;  %s72_s16 = sshll.u32 %s1449_s15, 4  ;;  %s45_s30 = int_to_ptr.vmem [resolvable:$true] %s44_s30  ;;  %s1540_s16 = int_to_ptr.vmem [resolvable:$true] %s72_s16 }
   0x8   :  { %s1192_s19 = scalar_lea.hbm %s1986_s1, 384 }
   0x9   :  { %p1193_p0 = scmp.ne.s32.totalorder %s1986_s1, %s1192_s19  ;;  %p1196_p1 = scmp.lt.u32.totalorder %s1192_s19, %s1986_s1 }
   0xb   :  { %p1198_p2 = pnand %p1196_p1, %p1193_p0 }
   0xd   :  { %1201 = shalt.err (!%p1198_p2)
}
   0xe   :  { %s1202_s24 = scalar_lea.vmem %s45_s30, 384  ;;  %p1207_p4 = scmp.lt.s32.totalorder %s45_s30, %s45_s30 }
   0xf   :  { %p1203_p3 = scmp.ne.s32.totalorder %s45_s30, %s1202_s24  ;;  %p1208_p5 = scmp.lt.s32.totalorder %s1202_s24, %s1202_s24 }
  0x11   :  { %p1209_p6 = por %p1208_p5, %p1207_p4 }
  0x13   :  { %p1210_p7 = pnand %p1209_p6, %p1203_p3 }
  0x15   :  { %1213 = shalt.err (!%p1210_p7)
}
  0x16   :  { %s1450_s25 = smov 128   ;;  %s1451_s26 = smov 8  }
  0x17   :  { %50 = dma.hbm_to_vmem [thread:$0]  %s1986_s1, 384, %s45_s30, [#allocation6], %s1450_s25, %s1450_s25, %s1451_s26  }
  0x18   :  { %s1214_s17 = scalar_lea.hbm %s1990_s5, 512 }
  0x19   :  { %p1215_p8 = scmp.ne.s32.totalorder %s1990_s5, %s1214_s17  ;;  %p1218_p9 = scmp.lt.u32.totalorder %s1214_s17, %s1990_s5 }
  0x1b   :  { %p1220_p10 = pnand %p1218_p9, %p1215_p8 }
  0x1d   :  { %1223 = shalt.err (!%p1220_p10)
}
  0x1e   :  { %s1224_s22 = scalar_lea.vmem %s1540_s16, 512  ;;  %p1229_p12 = scmp.lt.s32.totalorder %s1540_s16, %s1540_s16 }
  0x1f   :  { %p1225_p11 = scmp.ne.s32.totalorder %s1540_s16, %s1224_s22  ;;  %p1230_p13 = scmp.lt.s32.totalorder %s1224_s22, %s1224_s22 }
  0x21   :  { %p1231_p0 = por %p1230_p13, %p1229_p12 }
  0x23   :  { %p1232_p1 = pnand %p1231_p0, %p1225_p11 }
  0x25   :  { %1235 = shalt.err (!%p1232_p1)
}
  0x26   :  { %78 = dma.hbm_to_vmem [thread:$0]  %s1990_s5, 512, %s1540_s16, [#allocation9], %s1450_s25, %s1450_s25, %s1451_s26  }
  0x27   :  { %s1452_s23 = smov [#allocation2]   ;;  %s1453_s27 = smov [#allocation7]  }
  0x28   :  { %s32_s24 = sshll.u32 %s1452_s23, 4  ;;  %s56_s28 = sshll.u32 %s1453_s27, 4  ;;  %s33_s24 = int_to_ptr.vmem [resolvable:$true] %s32_s24  ;;  %s1577_s28 = int_to_ptr.vmem [resolvable:$true] %s56_s28 }
  0x29   :  { %s1236_s17 = scalar_lea.hbm %s1985_s0, 384 }
  0x2a   :  { %p1237_p2 = scmp.ne.s32.totalorder %s1985_s0, %s1236_s17  ;;  %p1240_p3 = scmp.lt.u32.totalorder %s1236_s17, %s1985_s0 }
  0x2c   :  { %p1242_p4 = pnand %p1240_p3, %p1237_p2 }
  0x2e   :  { %1245 = shalt.err (!%p1242_p4)
}
  0x2f   :  { %s1246_s5 = scalar_lea.vmem %s33_s24, 384  ;;  %p1251_p6 = scmp.lt.s32.totalorder %s33_s24, %s33_s24 }
  0x30   :  { %p1247_p5 = scmp.ne.s32.totalorder %s33_s24, %s1246_s5  ;;  %p1252_p7 = scmp.lt.s32.totalorder %s1246_s5, %s1246_s5 }
  0x32   :  { %p1253_p8 = por %p1252_p7, %p1251_p6 }
  0x34   :  { %p1254_p9 = pnand %p1253_p8, %p1247_p5 }
  0x36   :  { %1257 = shalt.err (!%p1254_p9)
}
  0x37   :  { %38 = dma.hbm_to_vmem [thread:$0]  %s1985_s0, 384, %s33_s24, [#allocation3], %s1450_s25, %s1450_s25, %s1451_s26  }
  0x38   :  { %s1258_s23 = scalar_lea.hbm %s1987_s2, 384 }
  0x39   :  { %p1259_p10 = scmp.ne.s32.totalorder %s1987_s2, %s1258_s23  ;;  %p1262_p11 = scmp.lt.u32.totalorder %s1258_s23, %s1987_s2 }
  0x3b   :  { %p1264_p12 = pnand %p1262_p11, %p1259_p10 }
  0x3d   :  { %1267 = shalt.err (!%p1264_p12)
}
  0x3e   :  { %s1268_s18 = scalar_lea.vmem %s1577_s28, 384  ;;  %p1273_p0 = scmp.lt.s32.totalorder %s1577_s28, %s1577_s28 }
  0x3f   :  { %p1269_p13 = scmp.ne.s32.totalorder %s1577_s28, %s1268_s18  ;;  %p1274_p1 = scmp.lt.s32.totalorder %s1268_s18, %s1268_s18 }
  0x41   :  { %p1275_p2 = por %p1274_p1, %p1273_p0 }
  0x43   :  { %p1276_p3 = pnand %p1275_p2, %p1269_p13 }
  0x45   :  { %1279 = shalt.err (!%p1276_p3)
}
  0x46   :  { %62 = dma.hbm_to_vmem [thread:$0]  %s1987_s2, 384, %s1577_s28, [#allocation6], %s1450_s25, %s1450_s25, %s1451_s26  }
  0x47   :  { %s1454_s19 = smov [#allocation10]   ;;  %s1455_s21 = smov [#allocation11]  }
  0x48   :  { %s86_s20 = sshll.u32 %s1454_s19, 4  ;;  %s98_s5 = sshll.u32 %s1455_s21, 4  ;;  %s87_s20 = int_to_ptr.vmem [resolvable:$true] %s86_s20  ;;  %s1614_s5 = int_to_ptr.vmem [resolvable:$true] %s98_s5 }
  0x49   :  { %s1280_s1 = scalar_lea.hbm %s1992_s7, 384 }
  0x4a   :  { %p1281_p4 = scmp.ne.s32.totalorder %s1992_s7, %s1280_s1  ;;  %p1284_p5 = scmp.lt.u32.totalorder %s1280_s1, %s1992_s7 }
  0x4c   :  { %p1286_p6 = pnand %p1284_p5, %p1281_p4 }
  0x4e   :  { %1289 = shalt.err (!%p1286_p6)
}
  0x4f   :  { %s1290_s2 = scalar_lea.vmem %s87_s20, 384  ;;  %p1295_p8 = scmp.lt.s32.totalorder %s87_s20, %s87_s20 }
  0x50   :  { %p1291_p7 = scmp.ne.s32.totalorder %s87_s20, %s1290_s2  ;;  %p1296_p9 = scmp.lt.s32.totalorder %s1290_s2, %s1290_s2 }
  0x52   :  { %p1297_p10 = por %p1296_p9, %p1295_p8 }
  0x54   :  { %p1298_p11 = pnand %p1297_p10, %p1291_p7 }
  0x56   :  { %1301 = shalt.err (!%p1298_p11)
}
  0x57   :  { %92 = dma.hbm_to_vmem [thread:$0]  %s1992_s7, 384, %s87_s20, [#allocation9], %s1450_s25, %s1450_s25, %s1451_s26  }
  0x58   :  { %s1302_s0 = scalar_lea.hbm %s1993_s8, 384 }
  0x59   :  { %p1303_p12 = scmp.ne.s32.totalorder %s1993_s8, %s1302_s0  ;;  %p1306_p13 = scmp.lt.u32.totalorder %s1302_s0, %s1993_s8 }
  0x5b   :  { %p1308_p0 = pnand %p1306_p13, %p1303_p12 }
  0x5d   :  { %1311 = shalt.err (!%p1308_p0)
}
  0x5e   :  { %s1312_s22 = scalar_lea.vmem %s1614_s5, 384  ;;  %p1317_p2 = scmp.lt.s32.totalorder %s1614_s5, %s1614_s5 }
  0x5f   :  { %p1313_p1 = scmp.ne.s32.totalorder %s1614_s5, %s1312_s22  ;;  %p1318_p3 = scmp.lt.s32.totalorder %s1312_s22, %s1312_s22 }
  0x61   :  { %p1319_p4 = por %p1318_p3, %p1317_p2 }
  0x63   :  { %p1320_p5 = pnand %p1319_p4, %p1313_p1 }
  0x65   :  { %1323 = shalt.err (!%p1320_p5)
}
  0x66   :  { %104 = dma.hbm_to_vmem [thread:$0]  %s1993_s8, 384, %s1614_s5, [#allocation12], %s1450_s25, %s1450_s25, %s1451_s26  }
  0x67   :  { %1434 = dma.done.wait [#allocation3], 384  }
  0x68   :  { %1435 = vsyncadd [#allocation3], 4294966912 }
  0x69   :  { %1436 = dma.done.wait [#allocation6], 768  }
  0x6a   :  { %1437 = vsyncadd [#allocation6], 4294966528 }
  0x6b   :  { %1438 = dma.done.wait [#allocation9], 896  }
  0x6c   :  { %1439 = vsyncadd [#allocation9], 4294966400 }
  0x6d   :  { %1440 = dma.done.wait [#allocation12], 384  }
  0x6e   :  { %1441 = vsyncadd [#allocation12], 4294966912  ;;  %v1456_v0 = vmov 0.0|0.0   ;;  %vm1457_vm0 = vmmov 0   ;;  %v1458_v1 = vmov 0.0   ;;  %v220_v2 = vld [vmem:[%s1988_s3] sm:$0xff] }
  0x6f   :  { %1072 = vmatprep.subr.bf16.mxu0 %v1456_v0  ;;  %1078 = vmatprep.subr.bf16.mxu1 %v1456_v0  ;;  %v221_v3 = vld [vmem:[%s1988_s3 + $0x8] sm:$0xff]  ;;  %v321_v6 = vld [vmem:[#allocation8 + $0x8] sm:$0xff]  ;;  %v223_v8 = vld [vmem:[%s1988_s3 + $0x18] sm:$0xff]  ;;  %vm137_vm1 = vcmask 261120   ;;  %vm144_vm2 = vcmask 257024   ;;  %s1461_s16 = smov [#allocation17]  }
  0x70   :  { %1016 = vmatprep.mubr.msk.f32.mxu0 %vm1457_vm0, %v1458_v1  ;;  %1033 = vmatprep.mubr.msk.f32.mxu1 %vm1457_vm0, %v1458_v1  ;;  %v320_v4 = vld [vmem:[#allocation8] sm:$0xff]  ;;  %v1073_v5 = vpack.c.bf16 %v221_v3, %v220_v2  ;;  %v222_v7 = vld [vmem:[%s1988_s3 + $0x10] sm:$0xff]  ;;  %v322_v10 = vld [vmem:[#allocation8 + $0x10] sm:$0xff]  ;;  %s920_s22 = sshll.u32 %s1461_s16, 4  ;;  %s1899_s22 = int_to_ptr.vmem [resolvable:$true] %s920_s22 }
  0x71   :  { %v1079_v9 = vpack.c.bf16 %v321_v6, %v320_v4  ;;  %v323_v11 = vld [vmem:[#allocation8 + $0x18] sm:$0xff]  ;;  %v1076_v12 = vpack.c.bf16 %v223_v8, %v222_v7  ;;  %v1671_v16 = vld [vmem:[#allocation5] sm:$0xff]  ;;  %v1673_v17 = vld [vmem:[#allocation2 + $0x8] sm:$0xff] }
  0x72   :  { %1074 = vmatpush3.bf16.msra.mxu0 %v1073_v5  ;;  %v1667_v13 = vld [vmem:[#allocation2] sm:$0xff]  ;;  %v1082_v14 = vpack.c.bf16 %v323_v11, %v322_v10  ;;  %v178_v19 = vmul.f32 %v1671_v16, %v1671_v16  ;;  %v135_v20 = vmul.f32 %v1673_v17, %v1673_v17  ;;  %v1684_v23 = vld [vmem:[#allocation2 + $0x10] sm:$0xf]  ;;  %v1687_v26 = vld [vmem:[#allocation5 + $0x10] sm:$0xf] }
  0x73   :  { %1080 = vmatpush3.bf16.msra.mxu1 %v1079_v9  ;;  %1075 = vmatprep.subr.bf16.mxu0 %v1456_v0  ;;  %v134_v15 = vmul.f32 %v1667_v13, %v1667_v13  ;;  %v1675_v18 = vld [vmem:[#allocation5 + $0x8] sm:$0xff]  ;;  %v131_v24 = vld [vmem:[#allocation7] sm:$0xff]  ;;  %v136_v28 = vmul.f32 %v1684_v23, %v1684_v23  ;;  %v180_v30 = vmul.f32 %v1687_v26, %v1687_v26  ;;  %v132_v31 = vld [vmem:[#allocation7 + $0x8] sm:$0xff] }
  0x74   :  { %1081 = vmatprep.subr.bf16.mxu1 %v1456_v0  ;;  %v179_v22 = vmul.f32 %v1675_v18, %v1675_v18  ;;  %v181_v25 = vsel %vm137_vm1, %v178_v19, 0.0  ;;  %v141_v27 = vsel %vm137_vm1, %v135_v20, 0.0  ;;  %v133_v34 = vld [vmem:[#allocation7 + $0x10] sm:$0xf]  ;;  %vm1086_vm15 = vmpackc.low %vm137_vm1, %vm137_vm1 }
  0x75   :  { %v138_v21 = vsel %vm137_vm1, %v134_v15, 0.0  ;;  %182 = vadd.xlane.f32.xlu1 %v181_v25  ;;  %v145_v32 = vsel %vm144_vm2, %v136_v28, 0.0  ;;  %v187_v33 = vsel %vm144_vm2, %v180_v30, 0.0  ;;  %v959_v54 = vld [vmem:[%s1989_s4] ss:$0 sm:$0xff] }
  0x76   :  { %1077 = vmatpush3.bf16.msra.mxu0 %v1076_v12  ;;  %139 = vadd.xlane.f32.xlu0 %v138_v21  ;;  %v184_v29 = vsel %vm137_vm1, %v179_v22, 0.0  ;;  %v963_v57 = vld [vmem:[%s1991_s6] ss:$0 sm:$0xff] }
  0x77   :  { %1083 = vmatpush3.bf16.msra.mxu1 %v1082_v14  ;;  %1084 = vmatprep.subr.bf16.mxu0 %v1456_v0 }
  0x78   :  { %1088 = vmatprep.subr.bf16.mxu1 %v1456_v0 }
  0x79   :  { %1017 = vmatmul.mubr.msk.f32.vlgmr.msra.gmra.mrb[0].mxu0 %vm137_vm1, %v131_v24  ;;  %185 = vadd.xlane.f32.xlu1 %v184_v29 }
  0x7a   :  { %1034 = vmatmul.mubr.msk.f32.vlgmr.msra.gmra.mrb[0].mxu1 %vm137_vm1, %v131_v24  ;;  %1019 = vmatprep.mubr.msk.f32.mxu0 %vm1457_vm0, %v1458_v1 }
  0x7b   :  { %1036 = vmatprep.mubr.msk.f32.mxu1 %vm1457_vm0, %v1458_v1  ;;  %142 = vadd.xlane.f32.xlu0 %v141_v27 }
  0x7d   :  { %1020 = vmatmul.mubr.msk.f32.gmra.mrb[2].mxu0 %vm137_vm1, %v132_v31  ;;  %188 = vadd.xlane.f32.xlu1 %v187_v33 }
  0x7e   :  { %1037 = vmatmul.mubr.msk.f32.gmra.mrb[2].mxu1 %vm137_vm1, %v132_v31  ;;  %1022 = vmatprep.mubr.msk.f32.mxu0 %vm1457_vm0, %v1458_v1 }
  0x7f   :  { %1039 = vmatprep.mubr.msk.f32.mxu1 %vm1457_vm0, %v1458_v1  ;;  %146 = vadd.xlane.f32.xlu0 %v145_v32 }
  0x81   :  { %1023 = vmatmul.mubr.msk.f32.gmra.mrb[4].mxu0 %vm137_vm1, %v133_v34 }
  0x82   :  { %1040 = vmatmul.mubr.msk.f32.gmra.mrb[4].mxu1 %vm137_vm1, %v133_v34  ;;  %1048 = vmatprep.mubr.msk.f32.mxu0 %vm1457_vm0, %v1458_v1 }
  0x83   :  { %1063 = vmatprep.mubr.msk.f32.mxu1 %vm1457_vm0, %v1458_v1 }
 0x102   :  { %v183_v36 = vpop.xlane.xlu1 %182 }
 0x103   :  { %v140_v35 = vpop.xlane.xlu0 %139  ;;  %vm192_vm6 = vcmp.eq.f32.partialorder %v183_v36, inf  ;;  %v195_v53 = vand.u32 2147483648, %v183_v36  ;;  %vm194_vm9 = vcmp.eq.f32.partialorder %v183_v36, 0.0 }
 0x104   :  { %1120 = vrsqrt.f32 %v140_v35  ;;  %vm150_vm3 = vcmp.eq.f32.partialorder %v140_v35, inf  ;;  %v153_v47 = vand.u32 2147483648, %v140_v35  ;;  %vm152_vm5 = vcmp.eq.f32.partialorder %v140_v35, 0.0 }
 0x106   :  { %v186_v38 = vpop.xlane.xlu1 %185 }
 0x107   :  { %vm199_vm8 = vcmp.eq.f32.partialorder %v186_v38, inf  ;;  %v202_v59 = vand.u32 2147483648, %v186_v38  ;;  %vm201_vm10 = vcmp.eq.f32.partialorder %v186_v38, 0.0 }
 0x108   :  { %v143_v37 = vpop.xlane.xlu0 %142 }
 0x109   :  { %1122 = vrsqrt.f32 %v143_v37  ;;  %vm157_vm4 = vcmp.eq.f32.partialorder %v143_v37, inf  ;;  %v160_v50 = vand.u32 2147483648, %v143_v37  ;;  %vm159_vm7 = vcmp.eq.f32.partialorder %v143_v37, 0.0 }
 0x10a   :  { %1124 = vrsqrt.f32 %v183_v36  ;;  %v1718_v46 = vpop.xlane.xlu1 %188 }
 0x10b   :  { %1126 = vrsqrt.f32 %v186_v38  ;;  %vm206_vm13 = vcmp.eq.f32.partialorder %v1718_v46, inf  ;;  %vm208_vm14 = vcmp.eq.f32.partialorder %v1718_v46, 0.0 }
 0x10c   :  { %v1715_v41 = vpop.xlane.xlu0 %146 }
 0x10d   :  { %1128 = vrsqrt.f32 %v1715_v41  ;;  %vm164_vm11 = vcmp.eq.f32.partialorder %v1715_v41, inf  ;;  %vm166_vm12 = vcmp.eq.f32.partialorder %v1715_v41, 0.0  ;;  %v167_v32 = vand.u32 2147483648, %v1715_v41 }
 0x10e   :  { %v1121_v39 = vpop.eup %1120  ;;  %1130 = vrsqrt.f32 %v1718_v46 }
 0x10f   :  { %v149_v43 = vmul.f32 %v1121_v39, %v140_v35 }
 0x111   :  { %v151_v49 = vsel %vm150_vm3, %v140_v35, %v149_v43 }
 0x112   :  { %v154_v55 = vsel %vm152_vm5, %v153_v47, %v151_v49  ;;  %v209_v47 = vand.u32 2147483648, %v1718_v46 }
 0x113   :  { %v1123_v40 = vpop.eup %1122  ;;  %v169_v2 = vmax.f32 %v154_v55, 1e-12 }
 0x114   :  { %v1125_v42 = vpop.eup %1124  ;;  %v156_v44 = vmul.f32 %v1123_v40, %v143_v37 }
 0x115   :  { %v1127_v45 = vpop.eup %1126  ;;  %v191_v48 = vmul.f32 %v1125_v42, %v183_v36  ;;  %1132 = vrcp.f32 %v169_v2 }
 0x116   :  { %v158_v51 = vsel %vm157_vm4, %v143_v37, %v156_v44  ;;  %v198_v52 = vmul.f32 %v1127_v45, %v186_v38 }
 0x117   :  { %v193_v56 = vsel %vm192_vm6, %v183_v36, %v191_v48  ;;  %v161_v58 = vsel %vm159_vm7, %v160_v50, %v158_v51  ;;  %v1129_v4 = vpop.eup %1128 }
 0x118   :  { %v200_v61 = vsel %vm199_vm8, %v186_v38, %v198_v52  ;;  %v196_v3 = vsel %vm194_vm9, %v195_v53, %v193_v56  ;;  %v170_v7 = vmax.f32 %v161_v58, 1e-12  ;;  %v163_v21 = vmul.f32 %v1129_v4, %v1715_v41  ;;  %v1131_v22 = vpop.eup %1130 }
 0x119   :  { %v203_v9 = vsel %vm201_vm10, %v202_v59, %v200_v61  ;;  %v211_v12 = vmax.f32 %v196_v3, 1e-12  ;;  %v205_v38 = vmul.f32 %v1131_v22, %v1718_v46 }
 0x11a   :  { %1134 = vrcp.f32 %v170_v7  ;;  %v212_v28 = vmax.f32 %v203_v9, 1e-12  ;;  %v165_v37 = vsel %vm164_vm11, %v1715_v41, %v163_v21 }
 0x11b   :  { %1136 = vrcp.f32 %v211_v12  ;;  %v168_v45 = vsel %vm166_vm12, %v167_v32, %v165_v37  ;;  %v207_v49 = vsel %vm206_vm13, %v1718_v46, %v205_v38 }
 0x11c   :  { %1138 = vrcp.f32 %v212_v28  ;;  %v171_v52 = vmax.f32 %v168_v45, 1e-12 }
 0x11e   :  { %1140 = vrcp.f32 %v171_v52 }
 0x11f   :  { %v1133_v51 = vpop.eup %1132 }
 0x120   :  { %v173_v56 = vmul.f32 %v1133_v51, %v1667_v13 }
 0x122   :  { %501 = vst.msk [vmem:[#allocation16] sm:$0xff] %vm137_vm1, %v173_v56 }
 0x124   :  { %v1135_v53 = vpop.eup %1134 }
 0x125   :  { %v1137_v55 = vpop.eup %1136 }
 0x126   :  { %v1139_v58 = vpop.eup %1138  ;;  %v215_v46 = vmul.f32 %v1137_v55, %v1671_v16 }
 0x128   :  { %504 = vst.msk [vmem:[#allocation17] sm:$0xff] %vm137_vm1, %v215_v46 }
 0x14c   :  { %v306_v60 = vpop.f32.mrb[0].mxu0 }
 0x14d   :  { %v1727_v62 = vadd.f32 %v959_v54, %v306_v60  ;;  %v397_v63 = vpop.f32.mrb[0].mxu1  ;;  %v1018_v0 = vpop.f32.mrb[1].mxu0  ;;  %v217_v60 = vmul.f32 %v1139_v58, %v1675_v18 }
 0x14e   :  { %v1729_v5 = vadd.f32 %v963_v57, %v397_v63  ;;  %v1035_v6 = vpop.f32.mrb[1].mxu1 }
 0x14f   :  { %v411_v8 = vmul.f32 %v1727_v62, %v1727_v62  ;;  %v1089_v13 = vpack.c.bf16 %v217_v60, %v215_v46  ;;  %505 = vst.msk [vmem:[#allocation17 + $0x8] sm:$0xff] %vm137_vm1, %v217_v60  ;;  %v507_v46 = vld [vmem:[#allocation11] sm:$0xff] }
 0x150   :  { %v311_v10 = vpop.f32.mrb[2].mxu0  ;;  %v453_v11 = vmul.f32 %v1729_v5, %v1729_v5 }
 0x151   :  { %v1736_v14 = vadd.f32 %v959_v54, %v311_v10  ;;  %v402_v15 = vpop.f32.mrb[2].mxu1  ;;  %v1021_v19 = vpop.f32.mrb[3].mxu0  ;;  %v414_v20 = vsel %vm137_vm1, %v411_v8, 0.0  ;;  %1091 = vmatpush3.bf16.xpose.msk.msra.mxu1 %vm1086_vm15, %v1089_v13 }
 0x152   :  { %v1740_v24 = vadd.f32 %v963_v57, %v402_v15  ;;  %v456_v25 = vsel %vm137_vm1, %v453_v11, 0.0  ;;  %415 = vadd.xlane.f32.xlu0 %v414_v20  ;;  %v1038_v27 = vpop.f32.mrb[3].mxu1  ;;  %1061 = vmatprep.subr.mxu1 %v1458_v1 }
 0x153   :  { %457 = vadd.xlane.f32.xlu1 %v456_v25  ;;  %v412_v29 = vmul.f32 %v1736_v14, %v1736_v14 }
 0x154   :  { %v316_v30 = vpop.f32.mrb[4].mxu0  ;;  %v454_v31 = vmul.f32 %v1740_v24, %v1740_v24 }
 0x155   :  { %v1749_v33 = vadd.f32 %v959_v54, %v316_v30  ;;  %v407_v34 = vpop.f32.mrb[4].mxu1  ;;  %v417_v35 = vsel %vm137_vm1, %v412_v29, 0.0  ;;  %v1024_v36 = vpop.f32.mrb[5].mxu0  ;;  %v210_v54 = vsel %vm208_vm14, %v209_v47, %v207_v49 }
 0x156   :  { %v1756_v39 = vadd.f32 %v963_v57, %v407_v34  ;;  %v459_v40 = vsel %vm137_vm1, %v454_v31, 0.0  ;;  %418 = vadd.xlane.f32.xlu0 %v417_v35  ;;  %v1041_v42 = vpop.f32.mrb[5].mxu1  ;;  %v213_v41 = vmax.f32 %v210_v54, 1e-12  ;;  %v175_v57 = vmul.f32 %v1135_v53, %v1673_v17  ;;  %v1141_v17 = vpop.eup %1140 }
 0x157   :  { %460 = vadd.xlane.f32.xlu1 %v459_v40  ;;  %v413_v43 = vmul.f32 %v1749_v33, %v1749_v33  ;;  %v177_v61 = vmul.f32 %v1141_v17, %v1684_v23 }
 0x158   :  { %v455_v44 = vmul.f32 %v1756_v39, %v1756_v39  ;;  %v1085_v59 = vpack.c.bf16 %v175_v57, %v173_v56  ;;  %502 = vst.msk [vmem:[#allocation16 + $0x8] sm:$0xff] %vm137_vm1, %v175_v57  ;;  %1142 = vrcp.f32 %v213_v41 }
 0x159   :  { %v420_v48 = vsel %vm144_vm2, %v413_v43, 0.0  ;;  %503 = vst.msk [vmem:[#allocation16 + $0x10] sm:$0xf] %vm144_vm2, %v177_v61 }
 0x15a   :  { %v462_v50 = vsel %vm144_vm2, %v455_v44, 0.0  ;;  %421 = vadd.xlane.f32.xlu0 %v420_v48  ;;  %1087 = vmatpush3.bf16.xpose.msk.msra.mxu0 %vm1086_vm15, %v1085_v59 }
 0x15b   :  { %463 = vadd.xlane.f32.xlu1 %v462_v50  ;;  %1046 = vmatprep.subr.mxu0 %v1458_v1 }
 0x162   :  { %v1143_v63 = vpop.eup %1142  ;;  %1047 = vmatpush3.xpose.msk.msra.mxu0 %vm137_vm1, %v177_v61 }
 0x163   :  { %v219_v16 = vmul.f32 %v1143_v63, %v1687_v26 }
 0x165   :  { %1062 = vmatpush3.xpose.msk.msra.mxu1 %vm137_vm1, %v219_v16  ;;  %506 = vst.msk [vmem:[#allocation17 + $0x10] sm:$0xf] %vm144_vm2, %v219_v16 }
 0x1df   :  { %v416_v18 = vpop.xlane.xlu0 %415 }
 0x1e0   :  { %v458_v0 = vpop.xlane.xlu1 %457  ;;  %1144 = vrsqrt.f32 %v416_v18  ;;  %vm425_vm3 = vcmp.eq.f32.partialorder %v416_v18, inf  ;;  %v428_v9 = vand.u32 2147483648, %v416_v18  ;;  %vm427_vm5 = vcmp.eq.f32.partialorder %v416_v18, 0.0 }
 0x1e1   :  { %1146 = vrsqrt.f32 %v458_v0  ;;  %vm467_vm4 = vcmp.eq.f32.partialorder %v458_v0, inf  ;;  %v470_v10 = vand.u32 2147483648, %v458_v0  ;;  %vm469_vm6 = vcmp.eq.f32.partialorder %v458_v0, 0.0 }
 0x1e3   :  { %v419_v2 = vpop.xlane.xlu0 %418 }
 0x1e4   :  { %v461_v3 = vpop.xlane.xlu1 %460  ;;  %1148 = vrsqrt.f32 %v419_v2  ;;  %vm432_vm7 = vcmp.eq.f32.partialorder %v419_v2, inf  ;;  %vm434_vm8 = vcmp.eq.f32.partialorder %v419_v2, 0.0  ;;  %v435_v29 = vand.u32 2147483648, %v419_v2 }
 0x1e5   :  { %1150 = vrsqrt.f32 %v461_v3  ;;  %vm474_vm9 = vcmp.eq.f32.partialorder %v461_v3, inf  ;;  %v477_v30 = vand.u32 2147483648, %v461_v3  ;;  %vm476_vm10 = vcmp.eq.f32.partialorder %v461_v3, 0.0 }
 0x1e7   :  { %v422_v23 = vpop.xlane.xlu0 %421 }
 0x1e8   :  { %v464_v4 = vpop.xlane.xlu1 %463  ;;  %1152 = vrsqrt.f32 %v422_v23  ;;  %vm439_vm11 = vcmp.eq.f32.partialorder %v422_v23, inf  ;;  %vm441_vm12 = vcmp.eq.f32.partialorder %v422_v23, 0.0  ;;  %v442_v44 = vand.u32 2147483648, %v422_v23 }
 0x1e9   :  { %1154 = vrsqrt.f32 %v464_v4  ;;  %vm481_vm13 = vcmp.eq.f32.partialorder %v464_v4, inf  ;;  %v484_v45 = vand.u32 2147483648, %v464_v4  ;;  %vm483_vm14 = vcmp.eq.f32.partialorder %v464_v4, 0.0 }
 0x1ea   :  { %v1145_v6 = vpop.eup %1144 }
 0x1eb   :  { %v1147_v7 = vpop.eup %1146  ;;  %v424_v8 = vmul.f32 %v1145_v6, %v416_v18 }
 0x1ec   :  { %v466_v26 = vmul.f32 %v1147_v7, %v458_v0 }
 0x1ed   :  { %v426_v11 = vsel %vm425_vm3, %v416_v18, %v424_v8 }
 0x1ee   :  { %v1149_v12 = vpop.eup %1148  ;;  %v468_v15 = vsel %vm467_vm4, %v458_v0, %v466_v26  ;;  %v429_v19 = vsel %vm427_vm5, %v428_v9, %v426_v11  ;;  %v509_v26 = vld [vmem:[#allocation11 + $0x10] sm:$0xf] }
 0x1ef   :  { %v1151_v20 = vpop.eup %1150  ;;  %v471_v21 = vsel %vm469_vm6, %v470_v10, %v468_v15  ;;  %v444_v22 = vmax.f32 %v429_v19, 1e-12  ;;  %v431_v25 = vmul.f32 %v1149_v12, %v419_v2 }
 0x1f0   :  { %v486_v27 = vmax.f32 %v471_v21, 1e-12  ;;  %v473_v28 = vmul.f32 %v1151_v20, %v461_v3 }
 0x1f1   :  { %1156 = vrcp.f32 %v444_v22  ;;  %v433_v31 = vsel %vm432_vm7, %v419_v2, %v431_v25 }
 0x1f2   :  { %v1153_v32 = vpop.eup %1152  ;;  %1158 = vrcp.f32 %v486_v27  ;;  %v475_v34 = vsel %vm474_vm9, %v461_v3, %v473_v28  ;;  %v436_v35 = vsel %vm434_vm8, %v435_v29, %v433_v31  ;;  %v1459_v31 = vmov 0  }
 0x1f3   :  { %v1155_v36 = vpop.eup %1154  ;;  %v478_v37 = vsel %vm476_vm10, %v477_v30, %v475_v34  ;;  %v445_v38 = vmax.f32 %v436_v35, 1e-12  ;;  %v438_v40 = vmul.f32 %v1153_v32, %v422_v23  ;;  %1113 = vset.pattern.permute.xlu0 %v1459_v31  ;;  %1119 = vset.pattern.permute.xlu1 %v1459_v31 }
 0x1f4   :  { %v487_v42 = vmax.f32 %v478_v37, 1e-12  ;;  %v480_v43 = vmul.f32 %v1155_v36, %v464_v4 }
 0x1f5   :  { %1160 = vrcp.f32 %v445_v38  ;;  %v440_v47 = vsel %vm439_vm11, %v422_v23, %v438_v40 }
 0x1f6   :  { %1162 = vrcp.f32 %v487_v42  ;;  %v482_v48 = vsel %vm481_vm13, %v464_v4, %v480_v43  ;;  %v443_v49 = vsel %vm441_vm12, %v442_v44, %v440_v47 }
 0x1f7   :  { %v485_v50 = vsel %vm483_vm14, %v484_v45, %v482_v48  ;;  %v446_v51 = vmax.f32 %v443_v49, 1e-12 }
 0x1f8   :  { %v488_v52 = vmax.f32 %v485_v50, 1e-12 }
 0x1f9   :  { %1164 = vrcp.f32 %v446_v51 }
 0x1fa   :  { %1166 = vrcp.f32 %v488_v52 }
 0x1fb   :  { %v1157_v53 = vpop.eup %1156 }
 0x1fc   :  { %v1159_v54 = vpop.eup %1158  ;;  %v448_v55 = vmul.f32 %v1157_v53, %v1727_v62 }
 0x1fd   :  { %v490_v41 = vmul.f32 %v1159_v54, %v1729_v5 }
 0x1fe   :  { %1049 = vmatmul.mubr.msk.f32.vlgmr.msra.gmra.mrb[6].mxu0 %vm137_vm1, %v448_v55  ;;  %495 = vst.msk [vmem:[#allocation13] sm:$0xff] %vm137_vm1, %v448_v55 }
 0x1ff   :  { %v1161_v56 = vpop.eup %1160  ;;  %1064 = vmatmul.mubr.msk.f32.vlgmr.msra.gmra.mrb[6].mxu1 %vm137_vm1, %v490_v41  ;;  %498 = vst.msk [vmem:[#allocation14] sm:$0xff] %vm137_vm1, %v490_v41  ;;  %1051 = vmatprep.mubr.msk.f32.mxu0 %vm1457_vm0, %v1458_v1 }
 0x200   :  { %v1163_v57 = vpop.eup %1162  ;;  %1066 = vmatprep.mubr.msk.f32.mxu1 %vm1457_vm0, %v1458_v1  ;;  %v450_v62 = vmul.f32 %v1161_v56, %v1736_v14 }
 0x201   :  { %v492_v5 = vmul.f32 %v1163_v57, %v1740_v24 }
 0x202   :  { %1052 = vmatmul.mubr.msk.f32.gmra.mrb[8].mxu0 %vm137_vm1, %v450_v62  ;;  %496 = vst.msk [vmem:[#allocation13 + $0x8] sm:$0xff] %vm137_vm1, %v450_v62 }
 0x203   :  { %v1165_v58 = vpop.eup %1164  ;;  %1067 = vmatmul.mubr.msk.f32.gmra.mrb[8].mxu1 %vm137_vm1, %v492_v5  ;;  %499 = vst.msk [vmem:[#allocation14 + $0x8] sm:$0xff] %vm137_vm1, %v492_v5  ;;  %1054 = vmatprep.mubr.msk.f32.mxu0 %vm1457_vm0, %v1458_v1 }
 0x204   :  { %v1167_v59 = vpop.eup %1166  ;;  %1069 = vmatprep.mubr.msk.f32.mxu1 %vm1457_vm0, %v1458_v1  ;;  %v452_v14 = vmul.f32 %v1165_v58, %v1749_v33  ;;  %vm634_vm0 = vcmask 162816   ;;  %v508_v33 = vld [vmem:[#allocation11 + $0x8] sm:$0xff] }
 0x205   :  { %v494_v24 = vmul.f32 %v1167_v59, %v1756_v39 }
 0x206   :  { %1055 = vmatmul.mubr.msk.f32.gmra.mrb[10].mxu0 %vm137_vm1, %v452_v14  ;;  %497 = vst.msk [vmem:[#allocation13 + $0x10] sm:$0xf] %vm144_vm2, %v452_v14 }
 0x207   :  { %1070 = vmatmul.mubr.msk.f32.gmra.mrb[10].mxu1 %vm137_vm1, %v494_v24  ;;  %500 = vst.msk [vmem:[#allocation14 + $0x10] sm:$0xf] %vm144_vm2, %v494_v24  ;;  %vm641_vm1 = vcmask 158720  }
 0x2d1   :  { %v614_v60 = vpop.f32.mrb[6].mxu0 }
 0x2d2   :  { %v628_v13 = vmul.f32 14.285714, %v614_v60  ;;  %v794_v17 = vpop.f32.mrb[6].mxu1  ;;  %v1050_v61 = vpop.f32.mrb[7].mxu0  ;;  %v514_v60 = vld [vmem:[%s1994_s9] sm:$0xff] }
 0x2d3   :  { %v808_v63 = vmul.f32 14.285714, %v794_v17  ;;  %v1065_v16 = vpop.f32.mrb[7].mxu1  ;;  %v516_v17 = vld [vmem:[%s1994_s9 + $0x10] sm:$0xf]  ;;  %vm521_vm2 = vcmp.lt.s32.totalorder %v514_v60, 2 }
 0x2d4   :  { %v1815_v18 = vadd.f32 %v628_v13, %v507_v46  ;;  %v515_v13 = vld [vmem:[%s1994_s9 + $0x8] sm:$0xff]  ;;  %vm523_vm3 = vcmp.lt.s32.totalorder %v516_v17, 2  ;;  %v967_v61 = vsel %vm521_vm2, 1.0, %v1458_v1  ;;  %s1460_s9 = smov [#allocation14]  }
 0x2d5   :  { %v619_v39 = vpop.f32.mrb[8].mxu0  ;;  %v1817_v0 = vadd.f32 %v808_v63, %v507_v46  ;;  %vm522_vm15 = vcmp.lt.s32.totalorder %v515_v13, 2  ;;  %v969_v16 = vsel %vm523_vm3, 1.0, %v1458_v1  ;;  %s896_s21 = sshll.u32 %s1460_s9, 4  ;;  %s897_s21 = int_to_ptr.vmem [resolvable:$true] %s896_s21 }
 0x2d6   :  { %v629_v2 = vmul.f32 14.285714, %v619_v39  ;;  %v799_v3 = vpop.f32.mrb[8].mxu1  ;;  %v1053_v23 = vpop.f32.mrb[9].mxu0  ;;  %v635_v4 = vsel %vm634_vm0, %v1815_v18, -inf  ;;  %v968_v63 = vsel %vm522_vm15, 1.0, %v1458_v1  ;;  %p1329_p7 = scmp.lt.s32.totalorder %s897_s21, %s897_s21 }
 0x2d7   :  { %v809_v6 = vmul.f32 14.285714, %v799_v3  ;;  %v1068_v7 = vpop.f32.mrb[9].mxu1  ;;  %636 = vmax.xlane.f32.xlu0 %v635_v4  ;;  %v814_v19 = vsel %vm634_vm0, %v1817_v0, -inf  ;;  %s1324_s7 = scalar_lea.vmem %s897_s21, 384 }
 0x2d8   :  { %v1821_v8 = vadd.f32 %v629_v2, %v508_v33  ;;  %p1325_p6 = scmp.ne.s32.totalorder %s897_s21, %s1324_s7  ;;  %p1330_p8 = scmp.lt.s32.totalorder %s1324_s7, %s1324_s7 }
 0x2d9   :  { %v624_v9 = vpop.f32.mrb[10].mxu0  ;;  %v1823_v10 = vadd.f32 %v809_v6, %v508_v33  ;;  %v1114_v33 = vpack.i.bf16 %v968_v63, %v967_v61 }
 0x2da   :  { %v630_v11 = vmul.f32 14.285714, %v624_v9  ;;  %v804_v12 = vpop.f32.mrb[10].mxu1  ;;  %v1056_v15 = vpop.f32.mrb[11].mxu0  ;;  %v638_v20 = vsel %vm634_vm0, %v1821_v8, -inf  ;;  %p1331_p9 = por %p1330_p8, %p1329_p7 }
 0x2db   :  { %v810_v21 = vmul.f32 14.285714, %v804_v12  ;;  %v1071_v22 = vpop.f32.mrb[11].mxu1  ;;  %815 = vmax.xlane.f32.xlu0 %v814_v19  ;;  %639 = vmax.xlane.f32.xlu1 %v638_v20  ;;  %v817_v28 = vsel %vm634_vm0, %v1823_v10, -inf }
 0x2dc   :  { %v1829_v25 = vadd.f32 %v630_v11, %v509_v26  ;;  %p1332_p10 = pnand %p1331_p9, %p1325_p6 }
 0x2dd   :  { %v1831_v27 = vadd.f32 %v810_v21, %v509_v26  ;;  %v510_v21 = vld [vmem:[#allocation10] sm:$0xff] }
 0x2de   :  { %v642_v29 = vsel %vm641_vm1, %v1829_v25, -inf }
 0x2df   :  { %818 = vmax.xlane.f32.xlu1 %v817_v28  ;;  %643 = vmax.xlane.f32.xlu0 %v642_v29  ;;  %v820_v30 = vsel %vm641_vm1, %v1831_v27, -inf }
 0x2e3   :  { %821 = vmax.xlane.f32.xlu1 %v820_v30  ;;  %v511_v30 = vld [vmem:[#allocation10 + $0x8] sm:$0xff] }
 0x364   :  { %v1839_v32 = vpop.xlane.xlu0 %636 }
 0x365   :  { %v645_v34 = vsub.f32 %v1815_v18, %v1839_v32 }
 0x367   :  { %v648_v35 = vmul.f32 1.442695, %v645_v34 }
 0x368   :  { %v1843_v36 = vpop.xlane.xlu1 %639  ;;  %v1845_v37 = vpop.xlane.xlu0 %815 }
 0x369   :  { %1168 = vpow2.f32 %v648_v35  ;;  %v646_v38 = vsub.f32 %v1821_v8, %v1843_v36  ;;  %v823_v40 = vsub.f32 %v1817_v0, %v1845_v37 }
 0x36b   :  { %v650_v42 = vmul.f32 1.442695, %v646_v38  ;;  %v826_v43 = vmul.f32 1.442695, %v823_v40 }
 0x36c   :  { %v1851_v44 = vpop.xlane.xlu1 %818  ;;  %v1853_v45 = vpop.xlane.xlu0 %643 }
 0x36d   :  { %1170 = vpow2.f32 %v650_v42  ;;  %v824_v47 = vsub.f32 %v1823_v10, %v1851_v44  ;;  %v647_v48 = vsub.f32 %v1829_v25, %v1853_v45 }
 0x36e   :  { %1172 = vpow2.f32 %v826_v43 }
 0x36f   :  { %v828_v49 = vmul.f32 1.442695, %v824_v47  ;;  %v652_v50 = vmul.f32 1.442695, %v647_v48 }
 0x370   :  { %v1859_v51 = vpop.xlane.xlu1 %821 }
 0x371   :  { %1174 = vpow2.f32 %v828_v49  ;;  %v825_v52 = vsub.f32 %v1831_v27, %v1859_v51 }
 0x372   :  { %1176 = vpow2.f32 %v652_v50 }
 0x373   :  { %v1169_v53 = vpop.eup %1168  ;;  %v830_v54 = vmul.f32 1.442695, %v825_v52 }
 0x374   :  { %v654_v55 = vsel %vm634_vm0, %v1169_v53, 0.0  ;;  %v512_v53 = vld [vmem:[#allocation10 + $0x10] sm:$0xf] }
 0x375   :  { %1178 = vpow2.f32 %v830_v54  ;;  %655 = vadd.xlane.f32.xlu0 %v654_v55 }
 0x377   :  { %v1171_v41 = vpop.eup %1170 }
 0x378   :  { %v1173_v56 = vpop.eup %1172  ;;  %v657_v57 = vsel %vm634_vm0, %v1171_v41, 0.0 }
 0x379   :  { %658 = vadd.xlane.f32.xlu1 %v657_v57  ;;  %v832_v62 = vsel %vm634_vm0, %v1173_v56, 0.0 }
 0x37a   :  { %833 = vadd.xlane.f32.xlu0 %v832_v62 }
 0x37b   :  { %v1175_v5 = vpop.eup %1174 }
 0x37c   :  { %v1177_v58 = vpop.eup %1176  ;;  %v835_v59 = vsel %vm634_vm0, %v1175_v5, 0.0 }
 0x37d   :  { %836 = vadd.xlane.f32.xlu1 %v835_v59  ;;  %v660_v14 = vsel %vm641_vm1, %v1177_v58, 0.0 }
 0x37e   :  { %661 = vadd.xlane.f32.xlu0 %v660_v14 }
 0x37f   :  { %v1179_v24 = vpop.eup %1178 }
 0x380   :  { %v838_v46 = vsel %vm641_vm1, %v1179_v24, 0.0 }
 0x381   :  { %839 = vadd.xlane.f32.xlu1 %v838_v46 }
 0x392   :  { %690 = vperm.xlu1 %1119, %v969_v16  }
 0x394   :  { %1115 = vperm.xlu0 %1113, %v1114_v33  }
 0x402   :  { %v656_v39 = vpop.xlane.xlu0 %655 }
 0x403   :  { %1180 = vlog2.f32 %v656_v39 }
 0x406   :  { %v659_v2 = vpop.xlane.xlu1 %658 }
 0x407   :  { %1182 = vlog2.f32 %v659_v2  ;;  %v834_v3 = vpop.xlane.xlu0 %833 }
 0x408   :  { %1184 = vlog2.f32 %v834_v3 }
 0x40a   :  { %v837_v23 = vpop.xlane.xlu1 %836 }
 0x40b   :  { %1186 = vlog2.f32 %v837_v23  ;;  %v662_v4 = vpop.xlane.xlu0 %661 }
 0x40c   :  { %1188 = vlog2.f32 %v662_v4 }
 0x40d   :  { %v1181_v6 = vpop.eup %1180 }
 0x40e   :  { %v664_v7 = vmul.f32 0.6931472, %v1181_v6  ;;  %v840_v26 = vpop.xlane.xlu1 %839 }
 0x40f   :  { %1190 = vlog2.f32 %v840_v26 }
 0x410   :  { %v669_v9 = vadd.f32 %v664_v7, %v1839_v32 }
 0x411   :  { %v1183_v1 = vpop.eup %1182 }
 0x412   :  { %v1185_v11 = vpop.eup %1184  ;;  %v666_v12 = vmul.f32 0.6931472, %v1183_v1  ;;  %v672_v15 = vsub.f32 %v1815_v18, %v669_v9  ;;  %v691_v41 = vpop.permute.xlu1 %690 }
 0x413   :  { %v842_v19 = vmul.f32 0.6931472, %v1185_v11  ;;  %v1116_v22 = vpop.permute.xlu0 %1115 }
 0x414   :  { %v670_v20 = vadd.f32 %v666_v12, %v1843_v36  ;;  %v1118_v38 = vunpack.i.h.bf16 %v1116_v22  ;;  %v675_v42 = vmul.f32 %v672_v15, %v510_v21  ;;  %v1117_v43 = vunpack.i.l.bf16 %v1116_v22 }
 0x415   :  { %v1187_v28 = vpop.eup %1186  ;;  %v847_v29 = vadd.f32 %v842_v19, %v1845_v37 }
 0x416   :  { %v1189_v31 = vpop.eup %1188  ;;  %v673_v34 = vsub.f32 %v1821_v8, %v670_v20  ;;  %v844_v35 = vmul.f32 0.6931472, %v1187_v28  ;;  %v693_v8 = vmul.f32 %v1117_v43, %v675_v42 }
 0x417   :  { %v850_v32 = vsub.f32 %v1817_v0, %v847_v29  ;;  %v668_v40 = vmul.f32 0.6931472, %v1189_v31 }
 0x418   :  { %v848_v18 = vadd.f32 %v844_v35, %v1851_v44  ;;  %v676_v47 = vmul.f32 %v673_v34, %v511_v30 }
 0x419   :  { %v1191_v36 = vpop.eup %1190  ;;  %v671_v48 = vadd.f32 %v668_v40, %v1853_v45  ;;  %v853_v50 = vmul.f32 %v850_v32, %v510_v21 }
 0x41a   :  { %v851_v49 = vsub.f32 %v1823_v10, %v848_v18  ;;  %v846_v37 = vmul.f32 0.6931472, %v1191_v36  ;;  %v694_v52 = vmul.f32 %v1118_v38, %v676_v47  ;;  %v696_v10 = vsel %vm634_vm0, %v693_v8, 0.0 }
 0x41b   :  { %v674_v54 = vsub.f32 %v1829_v25, %v671_v48  ;;  %v856_v62 = vmul.f32 %v1117_v43, %v853_v50 }
 0x41c   :  { %v849_v0 = vadd.f32 %v846_v37, %v1859_v51  ;;  %v854_v55 = vmul.f32 %v851_v49, %v511_v30  ;;  %v697_v44 = vsel %vm634_vm0, %v694_v52, 0.0 }
 0x41d   :  { %v677_v56 = vmul.f32 %v674_v54, %v512_v53  ;;  %v698_v59 = vadd.f32 %v697_v44, %v696_v10  ;;  %v859_v46 = vsel %vm634_vm0, %v856_v62, 0.0 }
 0x41e   :  { %v857_v57 = vmul.f32 %v1118_v38, %v854_v55  ;;  %v852_v45 = vsub.f32 %v1831_v27, %v849_v0 }
 0x41f   :  { %v695_v5 = vmul.f32 %v691_v41, %v677_v56 }
 0x420   :  { %v855_v58 = vmul.f32 %v852_v45, %v512_v53  ;;  %v860_v14 = vsel %vm634_vm0, %v857_v57, 0.0 }
 0x421   :  { %v699_v25 = vsel %vm641_vm1, %v695_v5, 0.0  ;;  %v861_v60 = vadd.f32 %v860_v14, %v859_v46 }
 0x422   :  { %v858_v24 = vmul.f32 %v855_v58, %v691_v41  ;;  %v700_v51 = vadd.f32 %v699_v25, %v698_v59 }
 0x424   :  { %701 = vadd.xlane.f32.xlu1 %v700_v51  ;;  %v862_v13 = vsel %vm641_vm1, %v858_v24, 0.0 }
 0x425   :  { %v863_v17 = vadd.f32 %v862_v13, %v861_v60 }
 0x427   :  { %864 = vadd.xlane.f32.xlu0 %v863_v17 }
 0x428   :  { %1335 = shalt.err (!%p1332_p10)
}
 0x429   :  { %s1336_s5 = scalar_lea.hbm %s1996_s11, 384 }
 0x42a   :  { %p1337_p11 = scmp.ne.s32.totalorder %s1996_s11, %s1336_s5  ;;  %p1340_p12 = scmp.lt.u32.totalorder %s1336_s5, %s1996_s11 }
 0x42c   :  { %p1342_p13 = pnand %p1340_p12, %p1337_p11 }
 0x42e   :  { %1345 = shalt.err (!%p1342_p13)
}
 0x42f   :  { %902 = dma.vmem_to_hbm [thread:$0]  %s897_s21, 384, %s1996_s11, [#allocation15], %s1450_s25, %s1450_s25, %s1451_s26  }
 0x430   :  { %s1346_s3 = scalar_lea.vmem %s1899_s22, 384  ;;  %p1351_p1 = scmp.lt.s32.totalorder %s1899_s22, %s1899_s22 }
 0x431   :  { %p1347_p0 = scmp.ne.s32.totalorder %s1899_s22, %s1346_s3  ;;  %p1352_p2 = scmp.lt.s32.totalorder %s1346_s3, %s1346_s3 }
 0x433   :  { %p1353_p3 = por %p1352_p2, %p1351_p1 }
 0x435   :  { %p1354_p4 = pnand %p1353_p3, %p1347_p0 }
 0x437   :  { %1357 = shalt.err (!%p1354_p4)
}
 0x438   :  { %s1358_s17 = scalar_lea.hbm %s1998_s13, 384 }
 0x439   :  { %p1359_p5 = scmp.ne.s32.totalorder %s1998_s13, %s1358_s17  ;;  %p1362_p6 = scmp.lt.u32.totalorder %s1358_s17, %s1998_s13 }
 0x43b   :  { %p1364_p7 = pnand %p1362_p6, %p1359_p5 }
 0x43d   :  { %1367 = shalt.err (!%p1364_p7)
}
 0x43e   :  { %926 = dma.vmem_to_hbm [thread:$0]  %s1899_s22, 384, %s1998_s13, [#allocation18], %s1450_s25, %s1450_s25, %s1451_s26  }
 0x43f   :  { %s1462_s19 = smov [#allocation13]   ;;  %s1463_s21 = smov [#allocation16]  }
 0x440   :  { %s884_s9 = sshll.u32 %s1462_s19, 4  ;;  %s908_s16 = sshll.u32 %s1463_s21, 4  ;;  %s885_s9 = int_to_ptr.vmem [resolvable:$true] %s884_s9  ;;  %s1936_s16 = int_to_ptr.vmem [resolvable:$true] %s908_s16 }
 0x441   :  { %s1368_s7 = scalar_lea.vmem %s885_s9, 384  ;;  %p1373_p9 = scmp.lt.s32.totalorder %s885_s9, %s885_s9 }
 0x442   :  { %p1369_p8 = scmp.ne.s32.totalorder %s885_s9, %s1368_s7  ;;  %p1374_p10 = scmp.lt.s32.totalorder %s1368_s7, %s1368_s7 }
 0x444   :  { %p1375_p11 = por %p1374_p10, %p1373_p9 }
 0x446   :  { %p1376_p12 = pnand %p1375_p11, %p1369_p8 }
 0x448   :  { %1379 = shalt.err (!%p1376_p12)
}
 0x449   :  { %s1380_s5 = scalar_lea.hbm %s1995_s10, 384 }
 0x44a   :  { %p1381_p13 = scmp.ne.s32.totalorder %s1995_s10, %s1380_s5  ;;  %p1384_p0 = scmp.lt.u32.totalorder %s1380_s5, %s1995_s10 }
 0x44c   :  { %p1386_p1 = pnand %p1384_p0, %p1381_p13 }
 0x44e   :  { %1389 = shalt.err (!%p1386_p1)
}
 0x44f   :  { %890 = dma.vmem_to_hbm [thread:$0]  %s885_s9, 384, %s1995_s10, [#allocation4], %s1450_s25, %s1450_s25, %s1451_s26  }
 0x450   :  { %s1390_s29 = scalar_lea.vmem %s1936_s16, 384  ;;  %p1395_p3 = scmp.lt.s32.totalorder %s1936_s16, %s1936_s16 }
 0x451   :  { %p1391_p2 = scmp.ne.s32.totalorder %s1936_s16, %s1390_s29  ;;  %p1396_p4 = scmp.lt.s32.totalorder %s1390_s29, %s1390_s29 }
 0x453   :  { %p1397_p5 = por %p1396_p4, %p1395_p3 }
 0x455   :  { %p1398_p6 = pnand %p1397_p5, %p1391_p2 }
 0x457   :  { %1401 = shalt.err (!%p1398_p6)
}
 0x458   :  { %s1402_s28 = scalar_lea.hbm %s1997_s12, 384 }
 0x459   :  { %p1403_p7 = scmp.ne.s32.totalorder %s1997_s12, %s1402_s28  ;;  %p1406_p8 = scmp.lt.u32.totalorder %s1402_s28, %s1997_s12 }
 0x45b   :  { %p1408_p9 = pnand %p1406_p8, %p1403_p7 }
 0x45d   :  { %1411 = shalt.err (!%p1408_p9)
}
 0x45e   :  { %914 = dma.vmem_to_hbm [thread:$0]  %s1936_s16, 384, %s1997_s12, [#allocation15], %s1450_s25, %s1450_s25, %s1451_s26   ;;  %vm877_vm4 = vcmask 0  }
 0x45f   :  { %s1464_s25 = smov [#allocation19]  }
 0x460   :  { %s933_s26 = sshll.u32 %s1464_s25, 4  ;;  %s934_s26 = int_to_ptr.vmem [resolvable:$true] %s933_s26 }
 0x461   :  { %s1412_s9 = scalar_lea.vmem %s934_s26, 16  ;;  %s1416_s21 = scalar_lea.vmem %s934_s26, 32 }
 0x462   :  { %p1413_p10 = scmp.ne.s32.totalorder %s934_s26, %s1412_s9  ;;  %p1417_p11 = scmp.lt.s32.totalorder %s934_s26, %s934_s26 }
 0x463   :  { %p1418_p12 = scmp.lt.s32.totalorder %s1416_s21, %s1412_s9 }
 0x465   :  { %p1419_p13 = por %p1418_p12, %p1417_p11 }
 0x467   :  { %p1420_p0 = pnand %p1419_p13, %p1413_p10 }
 0x4b1   :  { %v702_v27 = vpop.xlane.xlu1 %701 }
 0x4b2   :  { %v703_v61 = vrot.slane %v702_v27, 4 }
 0x4b4   :  { %v704_v63 = vadd.f32 %v703_v61, %v702_v27  ;;  %v865_v16 = vpop.xlane.xlu0 %864 }
 0x4b5   :  { %v866_v33 = vrot.slane %v865_v16, 4 }
 0x4b6   :  { %v705_v39 = vrot.slane %v704_v63, 2 }
 0x4b7   :  { %v867_v2 = vadd.f32 %v866_v33, %v865_v16 }
 0x4b8   :  { %v706_v3 = vadd.f32 %v705_v39, %v704_v63 }
 0x4b9   :  { %v868_v23 = vrot.slane %v867_v2, 2 }
 0x4ba   :  { %v707_v4 = vrot.slane %v706_v3, 1 }
 0x4bb   :  { %v869_v6 = vadd.f32 %v868_v23, %v867_v2 }
 0x4bc   :  { %v708_v7 = vadd.f32 %v707_v4, %v706_v3 }
 0x4bd   :  { %v870_v26 = vrot.slane %v869_v6, 1 }
 0x4be   :  { %1092 = vpush %v708_v7 }
 0x4bf   :  { %v871_v9 = vadd.f32 %v870_v26, %v869_v6 }
 0x4c1   :  { %1094 = vpush %v871_v9 }
 0x4ef   :  { %s1093_s0 = spop %1092 }
 0x4f2   :  { %s1095_s11 = spop %1094 }
 0x4f3   :  { %s873_s24 = sadd.f32 %s1095_s11, %s1093_s0 }
 0x4f5   :  { %s874_s12 = ssub.f32 0.0, %s873_s24 }
 0x4f7   :  { %s875_s19 = smul.f32 0.05, %s874_s12 }
 0x4f9   :  { %v876_v1 = vstv %s875_s19 }
 0x4fa   :  { %878 = vst.msk [vmem:[#allocation19] sm:$0x1] %vm877_vm4, %v876_v1 }
 0x4fb   :  { %1423 = shalt.err (!%p1420_p0)
}
 0x4fc   :  { %s1424_s20 = scalar_lea.hbm %s1999_s14, 16 }
 0x4fd   :  { %p1425_p1 = scmp.ne.s32.totalorder %s1999_s14, %s1424_s20  ;;  %p1428_p2 = scmp.lt.u32.totalorder %s1424_s20, %s1999_s14 }
 0x4ff   :  { %p1430_p3 = pnand %p1428_p2, %p1425_p1 }
 0x501   :  { %1433 = shalt.err (!%p1430_p3)
}
 0x502   :  { %936 = dma.vmem_to_hbm [thread:$0]  %s934_s26, 16, %s1999_s14, [#allocation18]  }
 0x503   :  { %1442 = dma.done.wait [#allocation4], 384  }
 0x504   :  { %1443 = vsyncadd [#allocation4], 4294966912 }
 0x505   :  { %1444 = dma.done.wait [#allocation15], 768  }
 0x506   :  { %1445 = vsyncadd [#allocation15], 4294966528 }
 0x507   :  { %1446 = dma.done.wait [#allocation18], 400  }
 0x508   :  { %1447 = vsyncadd [#allocation18], 4294966896 }
 0x509   :  { %952 = vsyncpa [#allocation3], 1 }
 0x50a   :  { %953 = vsyncpa [#allocation6], 1 }
 0x50b   :  { %954 = vsyncpa [#allocation9], 1 }
 0x50c   :  { %955 = vsyncpa [#allocation12], 1 }
 0x50d   :  { %956 = vsyncpa [#allocation4], 1 }
 0x50e   :  { %957 = vsyncpa [#allocation15], 1 }
 0x50f   :  { %958 = vsyncpa [#allocation18], 1 }

</bundles_post_ra>
